<compile_context>
chip_gen: v5e
topology: v5e:2x2
jax: 0.10.0
libtpu: 0.0.40
codegen_flags: <defaults>
</compile_context>

<pallas_src>
import functools

import jax
import jax.numpy as jnp
from jax.experimental import pallas as pl
from jax.experimental.pallas import tpu as pltpu


# ------------------------------ tiling helpers --------------------------------

_MAX_TILE_LANES = 32768          # ~(Cin + 2*Cout)*4 B/lane * 2 (dbl-buf) ≈ 5 MiB
_VMEM_LIMIT_BYTES = 48 * 1024 * 1024


def _cdiv(a, b):
    return (a + b - 1) // b


def _round_up(x, m):
    return _cdiv(x, m) * m


def _pick_spatial_tiling(hw, max_tile=_MAX_TILE_LANES):
    """Return (hw_pad, hw_tile, gh) with hw_pad = gh * hw_tile, hw_tile a
    multiple of 128 and <= max_tile. Padding waste is < (gh + 1) * 128 lanes."""
    hw128 = _round_up(hw, 128)
    if hw128 <= max_tile:
        return hw128, hw128, 1
    gh = _cdiv(hw128, max_tile)
    hw_tile = _round_up(_cdiv(hw128, gh), 128)
    return gh * hw_tile, hw_tile, gh


def _pick_batch_tile(n, hw_tile, target_lanes=_MAX_TILE_LANES):
    """Largest divisor of n such that nb * hw_tile <= target_lanes."""
    max_nb = max(1, target_lanes // hw_tile)
    nb = 1
    for d in range(1, min(n, max_nb) + 1):
        if n % d == 0:
            nb = d
    return nb


# ------------------------------- Pallas kernel --------------------------------

def _fused_head_mse_kernel(w_ref, b_ref, x_ref, y_ref, pred_ref, loss_ref, *,
                           hw_actual, needs_mask, inv_count):
    """Fused 1x1-conv (channel mix) + bias + pre-scaled MSE partial per step.

    w_ref:    (Cout, Cin)        VMEM  (tiny, revisited -> no re-DMA)
    b_ref:    (Cout, 1)          VMEM
    x_ref:    (Nb, Cin,  T)      VMEM  input tile,  T = hw_tile (lane axis)
    y_ref:    (Nb, Cout, T)      VMEM  label tile
    pred_ref: (Nb, Cout, T)      VMEM  prediction tile (lane-dense stores)
    loss_ref: (1, 1, 1, 1)       VMEM  per-(i, j) pre-scaled partial sum
    """
    nb, cin, t = x_ref.shape
    cout = pred_ref.shape[1]

    x = x_ref[...].astype(jnp.float32)                  # (Nb, Cin, T)
    w = w_ref[...].astype(jnp.float32)                  # (Cout, Cin)
    b = b_ref[...].astype(jnp.float32)                  # (Cout, 1)

    # Channel mix as unrolled VPU broadcast-FMAs (Cin=4 -> Cout=8: MXU is pointless).
    acc = w[:, 0:1][None, :, :] * x[:, 0:1, :]          # (Nb, Cout, T)
    for ci in range(1, cin):                            # static unroll
        acc = acc + w[:, ci:ci + 1][None, :, :] * x[:, ci:ci + 1, :]
    pred = acc + b[None, :, :]                          # (Nb, Cout, T)

    pred_ref[...] = pred.astype(pred_ref.dtype)

    # Squared diff while the pred tile is still hot.
    d = pred - y_ref[...].astype(jnp.float32)
    d2 = d * d

    if needs_mask:
        # Padded lanes (global spatial index >= HW) contribute 0 to the loss.
        j = pl.program_id(1)
        lane = jax.lax.broadcasted_iota(jnp.int32, (1, 1, t), 2)
        d2 = jnp.where(j * t + lane < hw_actual, d2, 0.0)

    # Lane-preserving fold (pure VPU adds) down to a single 128-lane slab,
    # then ONE small cross-lane/sublane reduce per grid step.
    part = d2[:, :, 0:128]
    for c in range(1, t // 128):                        # static unroll
        part = part + d2[:, :, c * 128:(c + 1) * 128]
    tile_sum = jnp.sum(part)

    # Pre-scaled per-(i, j) partial (1/(N*Cout*HW) folded in); wrapper just sums.
    loss_ref[...] = jnp.zeros(loss_ref.shape, jnp.float32) + tile_sum * inv_count


# -------------------------------- JAX wrapper ----------------------------------

def output_module_forward(x, label, params, prefix="OutputModule"):
    """Mirrors OutputModule.forward:
        pred = head(x); target = label; loss = MSE(pred, target);
        returns {prefix_MSELoss, prefix_predict, prefix_target}.
    """
    w = params["head_w"]                        # (Cout, Cin) -- Conv2d weight squeezed
    b = params["head_b"]                        # (Cout,)

    N, Cin, H, W = x.shape
    Cout = w.shape[0]
    HW = H * W

    hw_pad, hw_tile, gh = _pick_spatial_tiling(HW)
    nb = _pick_batch_tile(N, hw_tile)
    gn = N // nb
    needs_mask = hw_pad != HW

    # NCHW-native: pure reshapes (no transposes); pad the spatial axis only if
    # HW is not already a multiple of 128.
    x_flat = x.reshape(N, Cin, HW)
    y_flat = label.reshape(N, Cout, HW)
    if needs_mask:
        pad = hw_pad - HW
        x_flat = jnp.pad(x_flat, ((0, 0), (0, 0), (0, pad)))
        y_flat = jnp.pad(y_flat, ((0, 0), (0, 0), (0, pad)))
    b_col = b.reshape(Cout, 1)

    inv_count = 1.0 / float(N * Cout * HW)

    kernel = functools.partial(
        _fused_head_mse_kernel,
        hw_actual=HW, needs_mask=needs_mask, inv_count=inv_count)

    pred_flat, loss_partials = pl.pallas_call(
        kernel,
        out_shape=(
            jax.ShapeDtypeStruct((N, Cout, hw_pad), x.dtype),
            jax.ShapeDtypeStruct((gn, gh, 1, 1), jnp.float32),
        ),
        grid_spec=pltpu.PrefetchScalarGridSpec(
            num_scalar_prefetch=0,
            grid=(gn, gh),                               # both axes independent
            in_specs=[
                pl.BlockSpec((Cout, Cin), lambda i, j: (0, 0)),
                pl.BlockSpec((Cout, 1), lambda i, j: (0, 0)),
                pl.BlockSpec((nb, Cin, hw_tile), lambda i, j: (i, 0, j)),
                pl.BlockSpec((nb, Cout, hw_tile), lambda i, j: (i, 0, j)),
            ],
            out_specs=[
                pl.BlockSpec((nb, Cout, hw_tile), lambda i, j: (i, 0, j)),
                pl.BlockSpec((1, 1, 1, 1), lambda i, j: (i, j, 0, 0)),
            ],
        ),
        compiler_params=pltpu.CompilerParams(
            dimension_semantics=("parallel", "parallel"),
            vmem_limit_bytes=_VMEM_LIMIT_BYTES),
    )(w, b_col, x_flat, y_flat)

    # target = label  (self.target is None)
    target = label

    # Finalize MSE: partials are already scaled by 1/(N*Cout*HW); just sum.
    loss = jnp.sum(loss_partials)

    if needs_mask:
        pred_flat = pred_flat[:, :, :HW]
    pred = pred_flat.reshape(N, Cout, H, W)      # reshape only, still NCHW

    # convert_to_dict_with_name packaging (pure Python glue, no compute)
    result = {}
    result[f"{prefix}_MSELoss"] = loss
    result[f"{prefix}_predict"] = pred
    result[f"{prefix}_target"] = target
    return result


# ----------------------------------- main ---------------------------------------

if __name__ == "__main__":
    N, C_IN, C_OUT, H, W = 2, 4, 8, 16, 16

    key = jax.random.PRNGKey(0)
    k_x, k_lbl, k_w, k_b = jax.random.split(key, 4)

    x = jax.random.normal(k_x, (N, C_IN, H, W), dtype=jnp.float32)
    label = jax.random.normal(k_lbl, (N, C_OUT, H, W), dtype=jnp.float32)

    # Deterministic synthetic parameters for the Conv2d(4, 8, 1) head.
    params = {
        "head_w": jax.random.normal(k_w, (C_OUT, C_IN), dtype=jnp.float32) * 0.1,
        "head_b": jax.random.normal(k_b, (C_OUT,), dtype=jnp.float32) * 0.01,
    }

    result = jax.jit(output_module_forward)(x, label, params)
    result = jax.tree_util.tree_map(jax.block_until_ready, result)

    # Sanity check against a plain-JAX reference of the same computation.
    pred_ref = jnp.einsum("nchw,oc->nohw", x, params["head_w"]) \
        + params["head_b"][None, :, None, None]
    loss_ref = jnp.mean((pred_ref - label) ** 2)
    assert jnp.allclose(result["OutputModule_predict"], pred_ref, atol=1e-5)
    assert jnp.allclose(result["OutputModule_MSELoss"], loss_ref, atol=1e-5)

    print("KERNEL_OK")
</pallas_src>

<mosaic_0001>
module attributes {stable_mosaic.version = 11 : i64} {
  func.func @_fused_head_mse_kernel(%arg0: i32, %arg1: i32, %arg2: memref<8x4xf32, #tpu.memory_space<vmem>>, %arg3: memref<8x1xf32, #tpu.memory_space<vmem>>, %arg4: memref<2x4x256xf32, #tpu.memory_space<vmem>>, %arg5: memref<2x8x256xf32, #tpu.memory_space<vmem>>, %arg6: memref<2x8x256xf32, #tpu.memory_space<vmem>>, %arg7: memref<1x1x1x1xf32, #tpu.memory_space<vmem>>) attributes {dimension_semantics = [#tpu.dimension_semantics<parallel>, #tpu.dimension_semantics<parallel>], iteration_bounds = array<i64: 1, 1>, scalar_prefetch = 0 : i64, scratch_operands = 0 : i64, tpu.core_type = #tpu.core_type<tc>, window_params = [{pipeline_mode = #tpu.pipeline_mode<synchronous>, transform_indices = @transform_0, window_bounds = array<i64: 8, 4>}, {pipeline_mode = #tpu.pipeline_mode<synchronous>, transform_indices = @transform_1, window_bounds = array<i64: 8, 1>}, {transform_indices = @transform_2, window_bounds = array<i64: 2, 4, 256>}, {transform_indices = @transform_3, window_bounds = array<i64: 2, 8, 256>}, {transform_indices = @transform_4, window_bounds = array<i64: 2, 8, 256>}, {transform_indices = @transform_5, window_bounds = array<i64: 1, 1, 1, 1>}]} {
    %c0 = arith.constant 0 : index
    %c0_0 = arith.constant 0 : index
    %c0_1 = arith.constant 0 : index
    %0 = vector.load %arg4[%c0, %c0_0, %c0_1] : memref<2x4x256xf32, #tpu.memory_space<vmem>>, vector<2x4x256xf32>
    %c0_2 = arith.constant 0 : index
    %c0_3 = arith.constant 0 : index
    %1 = vector.load %arg2[%c0_2, %c0_3] : memref<8x4xf32, #tpu.memory_space<vmem>>, vector<8x4xf32>
    %c0_4 = arith.constant 0 : index
    %c0_5 = arith.constant 0 : index
    %2 = vector.load %arg3[%c0_4, %c0_5] : memref<8x1xf32, #tpu.memory_space<vmem>>, vector<8x1xf32>
    %3 = vector.extract_strided_slice %1 {offsets = [0, 0], sizes = [8, 1], strides = [1, 1]} : vector<8x4xf32> to vector<8x1xf32>
    %4 = vector.shape_cast %3 : vector<8x1xf32> to vector<1x8x1xf32>
    %5 = vector.extract_strided_slice %0 {offsets = [0, 0, 0], sizes = [2, 1, 256], strides = [1, 1, 1]} : vector<2x4x256xf32> to vector<2x1x256xf32>
    %6 = vector.broadcast %4 : vector<1x8x1xf32> to vector<2x8x256xf32>
    %7 = vector.broadcast %5 : vector<2x1x256xf32> to vector<2x8x256xf32>
    %8 = arith.mulf %6, %7 : vector<2x8x256xf32>
    %9 = vector.extract_strided_slice %1 {offsets = [0, 1], sizes = [8, 1], strides = [1, 1]} : vector<8x4xf32> to vector<8x1xf32>
    %10 = vector.shape_cast %9 : vector<8x1xf32> to vector<1x8x1xf32>
    %11 = vector.extract_strided_slice %0 {offsets = [0, 1, 0], sizes = [2, 1, 256], strides = [1, 1, 1]} : vector<2x4x256xf32> to vector<2x1x256xf32>
    %12 = vector.broadcast %10 : vector<1x8x1xf32> to vector<2x8x256xf32>
    %13 = vector.broadcast %11 : vector<2x1x256xf32> to vector<2x8x256xf32>
    %14 = arith.mulf %12, %13 : vector<2x8x256xf32>
    %15 = arith.addf %8, %14 : vector<2x8x256xf32>
    %16 = vector.extract_strided_slice %1 {offsets = [0, 2], sizes = [8, 1], strides = [1, 1]} : vector<8x4xf32> to vector<8x1xf32>
    %17 = vector.shape_cast %16 : vector<8x1xf32> to vector<1x8x1xf32>
    %18 = vector.extract_strided_slice %0 {offsets = [0, 2, 0], sizes = [2, 1, 256], strides = [1, 1, 1]} : vector<2x4x256xf32> to vector<2x1x256xf32>
    %19 = vector.broadcast %17 : vector<1x8x1xf32> to vector<2x8x256xf32>
    %20 = vector.broadcast %18 : vector<2x1x256xf32> to vector<2x8x256xf32>
    %21 = arith.mulf %19, %20 : vector<2x8x256xf32>
    %22 = arith.addf %15, %21 : vector<2x8x256xf32>
    %23 = vector.extract_strided_slice %1 {offsets = [0, 3], sizes = [8, 1], strides = [1, 1]} : vector<8x4xf32> to vector<8x1xf32>
    %24 = vector.shape_cast %23 : vector<8x1xf32> to vector<1x8x1xf32>
    %25 = vector.extract_strided_slice %0 {offsets = [0, 3, 0], sizes = [2, 1, 256], strides = [1, 1, 1]} : vector<2x4x256xf32> to vector<2x1x256xf32>
    %26 = vector.broadcast %24 : vector<1x8x1xf32> to vector<2x8x256xf32>
    %27 = vector.broadcast %25 : vector<2x1x256xf32> to vector<2x8x256xf32>
    %28 = arith.mulf %26, %27 : vector<2x8x256xf32>
    %29 = arith.addf %22, %28 : vector<2x8x256xf32>
    %30 = vector.shape_cast %2 : vector<8x1xf32> to vector<1x8x1xf32>
    %31 = vector.broadcast %30 : vector<1x8x1xf32> to vector<2x8x256xf32>
    %32 = arith.addf %29, %31 : vector<2x8x256xf32>
    %c0_6 = arith.constant 0 : index
    %c0_7 = arith.constant 0 : index
    %c0_8 = arith.constant 0 : index
    %33 = vector.load %arg6[%c0_6, %c0_7, %c0_8] : memref<2x8x256xf32, #tpu.memory_space<vmem>>, vector<2x8x256xf32>
    tpu.vector_store %arg6[%c0_6, %c0_7, %c0_8], %32 {strides = array<i32>} : memref<2x8x256xf32, #tpu.memory_space<vmem>>, vector<2x8x256xf32>,
    %c0_9 = arith.constant 0 : index
    %c0_10 = arith.constant 0 : index
    %c0_11 = arith.constant 0 : index
    %34 = vector.load %arg5[%c0_9, %c0_10, %c0_11] : memref<2x8x256xf32, #tpu.memory_space<vmem>>, vector<2x8x256xf32>
    %35 = arith.subf %32, %34 : vector<2x8x256xf32>
    %36 = arith.mulf %35, %35 : vector<2x8x256xf32>
    %37 = vector.extract_strided_slice %36 {offsets = [0, 0, 0], sizes = [2, 8, 128], strides = [1, 1, 1]} : vector<2x8x256xf32> to vector<2x8x128xf32>
    %38 = vector.extract_strided_slice %36 {offsets = [0, 0, 128], sizes = [2, 8, 128], strides = [1, 1, 1]} : vector<2x8x256xf32> to vector<2x8x128xf32>
    %39 = arith.addf %37, %38 : vector<2x8x128xf32>
    %40 = vector.shape_cast %39 : vector<2x8x128xf32> to vector<1x2x8x128xf32>
    %cst = arith.constant dense<0.000000e+00> : vector<1xf32>
    %41 = vector.multi_reduction <add>, %40, %cst [1, 2, 3] : vector<1x2x8x128xf32> to vector<1xf32>
    %42 = vector.shape_cast %41 : vector<1xf32> to vector<1x1x1x1xf32>
    %43 = vector.extract %42[0, 0, 0, 0] : f32 from vector<1x1x1x1xf32>
    %cst_12 = arith.constant 0.000000e+00 : f32
    %44 = vector.broadcast %cst_12 : f32 to vector<1x1x1x1xf32>
    %cst_13 = arith.constant 2.44140625E-4 : f32
    %45 = arith.mulf %43, %cst_13 : f32
    %46 = vector.broadcast %45 : f32 to vector<1x1x1x1xf32>
    %47 = arith.addf %44, %46 : vector<1x1x1x1xf32>
    %c0_14 = arith.constant 0 : index
    %c0_15 = arith.constant 0 : index
    %c0_16 = arith.constant 0 : index
    %c0_17 = arith.constant 0 : index
    %48 = vector.load %arg7[%c0_14, %c0_15, %c0_16, %c0_17] : memref<1x1x1x1xf32, #tpu.memory_space<vmem>>, vector<1x1x1x1xf32>
    tpu.vector_store %arg7[%c0_14, %c0_15, %c0_16, %c0_17], %47 {strides = array<i32>} : memref<1x1x1x1xf32, #tpu.memory_space<vmem>>, vector<1x1x1x1xf32>,
    return
  }
  func.func @transform_0(%arg0: i32, %arg1: i32) -> (i32, i32) {
    %c0_i32 = arith.constant 0 : i32
    %c0_i32_0 = arith.constant 0 : i32
    %c0_i32_1 = arith.constant 0 : i32
    return %c0_i32, %c0_i32_0 : i32, i32
  }
  func.func @transform_1(%arg0: i32, %arg1: i32) -> (i32, i32) {
    %c0_i32 = arith.constant 0 : i32
    %c0_i32_0 = arith.constant 0 : i32
    %c0_i32_1 = arith.constant 0 : i32
    return %c0_i32, %c0_i32_0 : i32, i32
  }
  func.func @transform_2(%arg0: i32, %arg1: i32) -> (i32, i32, i32) {
    %c0_i32 = arith.constant 0 : i32
    %c0_i32_0 = arith.constant 0 : i32
    return %arg0, %c0_i32, %arg1 : i32, i32, i32
  }
  func.func @transform_3(%arg0: i32, %arg1: i32) -> (i32, i32, i32) {
    %c0_i32 = arith.constant 0 : i32
    %c0_i32_0 = arith.constant 0 : i32
    return %arg0, %c0_i32, %arg1 : i32, i32, i32
  }
  func.func @transform_4(%arg0: i32, %arg1: i32) -> (i32, i32, i32) {
    %c0_i32 = arith.constant 0 : i32
    %c0_i32_0 = arith.constant 0 : i32
    return %arg0, %c0_i32, %arg1 : i32, i32, i32
  }
  func.func @transform_5(%arg0: i32, %arg1: i32) -> (i32, i32, i32, i32) {
    %c0_i32 = arith.constant 0 : i32
    %c0_i32_0 = arith.constant 0 : i32
    %c0_i32_1 = arith.constant 0 : i32
    return %arg0, %arg1, %c0_i32, %c0_i32_0 : i32, i32, i32, i32
  }
}

</mosaic_0001>

<bundles_post_ra>
// kernel: output_module_forward.1
= control target key start
LH: loop header
LB: loop body
LE: loop exit
PB: predicated region body
PF: predicated region fallthrough
CT: control target
= control target key end

     0   :  { %v220_v1 = vmov 0   ;;  %v221_v2 = vmov 2   ;;  %s294_s0 = inlined_call_operand.vmem [shape: f32[8,4], index: 0, kind: input, shape index: {}]   ;;  %s295_s1 = inlined_call_operand.vmem [shape: f32[8,1], index: 1, kind: input, shape index: {}]   ;;  %s296_s2 = inlined_call_operand.vmem [shape: f32[2,4,256], index: 2, kind: input, shape index: {}]   ;;  %s297_s3 = inlined_call_operand.vmem [shape: f32[2,8,256], index: 3, kind: input, shape index: {}]   ;;  %s298_s4 = inlined_call_operand.vmem [shape: f32[2,8,256], index: 4, kind: output, shape index: {0}]   ;;  %s299_s5 = inlined_call_operand.hbm [shape: f32[1,1,1,1], index: 5, kind: output, shape index: {1}]  }
   0x1   :  { %v22_v0 = vld [vmem:[%s294_s0] sm:$0xff]  ;;  %188 = vset.pattern.permute.xlu0 %v220_v1  ;;  %190 = vset.pattern.permute.xlu1 %v221_v2 }
   0x2   :  { %v23_v3 = vld [vmem:[%s295_s1] sm:$0xff] }
   0x3   :  { %11 = vsyncpa [#allocation3], 0  ;;  %26 = vperm.xlu0 %188, %v22_v0   ;;  %72 = vperm.xlu1 %190, %v22_v0   ;;  %v222_v4 = vmov 1   ;;  %v223_v5 = vmov 3   ;;  %v20_v6 = vld [vmem:[%s296_s2] sm:$0xff]  ;;  %v21_v7 = vld [vmem:[%s296_s2 + $0x8] sm:$0xff] }
   0x4   :  { %192 = vset.pattern.permute.xlu2 %v220_v1  ;;  %v31_v9 = vperm.slane %v20_v6, 0  ;;  %v32_v10 = vperm.slane %v20_v6, 4  ;;  %v33_v11 = vperm.slane %v21_v7, 0  ;;  %v34_v12 = vperm.slane %v21_v7, 4  ;;  %s224_s13 = smov [#allocation2]   ;;  %s170_s17 = sshll.u32 %s299_s5, 4  ;;  %s171_s17 = int_to_ptr.hbm [resolvable:$true] %s170_s17 }
   0x5   :  { %121 = vperm.xlu2 %192, %v23_v3   ;;  %v75_v14 = vperm.slane %v20_v6, 2  ;;  %v76_v15 = vperm.slane %v20_v6, 6  ;;  %v77_v16 = vperm.slane %v21_v7, 2  ;;  %v78_v17 = vperm.slane %v21_v7, 6  ;;  %s168_s14 = sshll.u32 %s224_s13, 4  ;;  %s169_s14 = int_to_ptr.vmem [resolvable:$true] %s168_s14 }
   0x6   :  { %v51_v18 = vperm.slane %v20_v6, 1  ;;  %v52_v19 = vperm.slane %v20_v6, 5  ;;  %v53_v20 = vperm.slane %v21_v7, 1  ;;  %v54_v21 = vperm.slane %v21_v7, 5 }
   0x7   :  { %v99_v22 = vperm.slane %v20_v6, 3  ;;  %v100_v23 = vperm.slane %v20_v6, 7  ;;  %v101_v24 = vperm.slane %v21_v7, 3  ;;  %v102_v25 = vperm.slane %v21_v7, 7 }
   0x8   :  { %v39_v26 = vperm.slane %v31_v9, 0  ;;  %v40_v27 = vperm.slane %v32_v10, 0  ;;  %v41_v28 = vperm.slane %v33_v11, 0  ;;  %v42_v29 = vperm.slane %v34_v12, 0  ;;  %v132_v9 = vld [vmem:[%s297_s3] sm:$0xff]  ;;  %v133_v10 = vld [vmem:[%s297_s3 + $0x8] sm:$0xff] }
   0x9   :  { %v83_v30 = vperm.slane %v75_v14, 2  ;;  %v84_v31 = vperm.slane %v76_v15, 2  ;;  %v85_v32 = vperm.slane %v77_v16, 2  ;;  %v86_v33 = vperm.slane %v78_v17, 2  ;;  %v134_v11 = vld [vmem:[%s297_s3 + $0x10] sm:$0xff]  ;;  %v135_v12 = vld [vmem:[%s297_s3 + $0x18] sm:$0xff] }
   0xa   :  { %v59_v34 = vperm.slane %v51_v18, 1  ;;  %v60_v35 = vperm.slane %v52_v19, 1  ;;  %v61_v36 = vperm.slane %v53_v20, 1  ;;  %v62_v37 = vperm.slane %v54_v21, 1 }
   0xb   :  { %189 = vset.pattern.permute.xlu0 %v222_v4  ;;  %191 = vset.pattern.permute.xlu1 %v223_v5  ;;  %v107_v38 = vperm.slane %v99_v22, 3  ;;  %v108_v39 = vperm.slane %v100_v23, 3  ;;  %v109_v40 = vperm.slane %v101_v24, 3  ;;  %v110_v41 = vperm.slane %v102_v25, 3 }
   0xc   :  { %48 = vperm.xlu0 %189, %v22_v0   ;;  %96 = vperm.xlu1 %191, %v22_v0   ;;  %vm159_vm0 = vcmask 0  }
  0x14   :  { %193 = vset.pattern.permute.xlu0 %v220_v1 }
  0x5f   :  { %v122_v4 = vpop.permute.xlu2 %121 }
  0x75   :  { %v27_v8 = vpop.permute.xlu0 %26  ;;  %v73_v13 = vpop.permute.xlu1 %72 }
  0x76   :  { %v43_v42 = vmul.f32 %v39_v26, %v27_v8  ;;  %v44_v43 = vmul.f32 %v40_v27, %v27_v8  ;;  %v45_v44 = vmul.f32 %v41_v28, %v27_v8  ;;  %v46_v45 = vmul.f32 %v42_v29, %v27_v8 }
  0x77   :  { %v87_v46 = vmul.f32 %v83_v30, %v73_v13  ;;  %v88_v47 = vmul.f32 %v84_v31, %v73_v13  ;;  %v89_v48 = vmul.f32 %v85_v32, %v73_v13  ;;  %v90_v49 = vmul.f32 %v86_v33, %v73_v13 }
  0x7e   :  { %v49_v50 = vpop.permute.xlu0 %48  ;;  %v97_v51 = vpop.permute.xlu1 %96 }
  0x7f   :  { %v63_v52 = vmul.f32 %v59_v34, %v49_v50  ;;  %v64_v53 = vmul.f32 %v60_v35, %v49_v50  ;;  %v65_v54 = vmul.f32 %v61_v36, %v49_v50  ;;  %v66_v55 = vmul.f32 %v62_v37, %v49_v50 }
  0x80   :  { %v111_v56 = vmul.f32 %v107_v38, %v97_v51  ;;  %v112_v57 = vmul.f32 %v108_v39, %v97_v51  ;;  %v113_v58 = vmul.f32 %v109_v40, %v97_v51  ;;  %v114_v59 = vmul.f32 %v110_v41, %v97_v51 }
  0x81   :  { %v67_v60 = vadd.f32 %v63_v52, %v43_v42  ;;  %v68_v61 = vadd.f32 %v64_v53, %v44_v43  ;;  %v69_v62 = vadd.f32 %v65_v54, %v45_v44  ;;  %v70_v63 = vadd.f32 %v66_v55, %v46_v45 }
  0x83   :  { %v91_v0 = vadd.f32 %v87_v46, %v67_v60  ;;  %v92_v1 = vadd.f32 %v88_v47, %v68_v61  ;;  %v93_v2 = vadd.f32 %v89_v48, %v69_v62  ;;  %v94_v3 = vadd.f32 %v90_v49, %v70_v63 }
  0x85   :  { %v115_v5 = vadd.f32 %v111_v56, %v91_v0  ;;  %v116_v6 = vadd.f32 %v112_v57, %v92_v1  ;;  %v117_v7 = vadd.f32 %v113_v58, %v93_v2  ;;  %v118_v8 = vadd.f32 %v114_v59, %v94_v3 }
  0x87   :  { %v124_v13 = vadd.f32 %v122_v4, %v115_v5  ;;  %v125_v14 = vadd.f32 %v122_v4, %v116_v6  ;;  %v126_v15 = vadd.f32 %v122_v4, %v117_v7  ;;  %v127_v16 = vadd.f32 %v122_v4, %v118_v8 }
  0x89   :  { %128 = vst [vmem:[%s298_s4] sm:$0xff] %v124_v13  ;;  %v136_v17 = vsub.f32 %v124_v13, %v132_v9  ;;  %v137_v18 = vsub.f32 %v125_v14, %v133_v10  ;;  %v138_v19 = vsub.f32 %v126_v15, %v134_v11  ;;  %v139_v20 = vsub.f32 %v127_v16, %v135_v12 }
  0x8a   :  { %129 = vst [vmem:[%s298_s4 + $0x8] sm:$0xff] %v125_v14 }
  0x8b   :  { %130 = vst [vmem:[%s298_s4 + $0x10] sm:$0xff] %v126_v15  ;;  %v140_v21 = vmul.f32 %v136_v17, %v136_v17  ;;  %v141_v22 = vmul.f32 %v137_v18, %v137_v18  ;;  %v142_v23 = vmul.f32 %v138_v19, %v138_v19  ;;  %v143_v24 = vmul.f32 %v139_v20, %v139_v20 }
  0x8c   :  { %131 = vst [vmem:[%s298_s4 + $0x18] sm:$0xff] %v127_v16 }
  0x8d   :  { %v144_v25 = vadd.f32 %v141_v22, %v140_v21  ;;  %v145_v26 = vadd.f32 %v143_v24, %v142_v23 }
  0x8f   :  { %v146_v27 = vadd.f32 %v145_v26, %v144_v25 }
  0x91   :  { %147 = vadd.xlane.f32.xlu2 %v146_v27 }
 0x104   :  { %v148_v28 = vpop.xlane.xlu2 %147 }
 0x105   :  { %v149_v29 = vrot.slane %v148_v28, 4 }
 0x107   :  { %v150_v30 = vadd.f32 %v149_v29, %v148_v28 }
 0x109   :  { %v151_v31 = vrot.slane %v150_v30, 2 }
 0x10b   :  { %v152_v32 = vadd.f32 %v151_v31, %v150_v30 }
 0x10d   :  { %v153_v33 = vrot.slane %v152_v32, 1 }
 0x10f   :  { %v154_v34 = vadd.f32 %v153_v33, %v152_v32 }
 0x111   :  { %181 = vpush %v154_v34 }
 0x142   :  { %s182_s18 = spop %181 }
 0x143   :  { %s156_s4 = smul.f32 0.00024414063, %s182_s18 }
 0x145   :  { %v157_v35 = vstv %s156_s4 }
 0x146   :  { %160 = vst.msk [vmem:[#allocation2] sm:$0x1] %vm159_vm0, %v157_v35 }
 0x147   :  { %173 = dma.vmem_to_hbm [thread:$0]  %s169_s14, 16, %s171_s17, [#allocation3]  }
 0x148   :  { %218 = dma.done.wait [#allocation3], 16  }
 0x149   :  { %219 = vsyncadd [#allocation3], 4294967280 }
 0x14a   :  { %180 = vsyncpa [#allocation3], 1 }

</bundles_post_ra>
